<compile_context>
chip_gen: v7x
topology: tpu7x:2x2x1
jax: 0.10.0
libtpu: 0.0.40
codegen_flags: <defaults>
</compile_context>

<pallas_src>
import numpy as np
import jax
import jax.numpy as jnp
from jax import lax
from jax.experimental import pallas as pl
from jax.experimental.pallas import tpu as pltpu


def _round_up(x, m):
    return ((x + m - 1) // m) * m


# ---------------------------------------------------------------------------
# Kernels
# ---------------------------------------------------------------------------
def _downsample_dense_kernel(m_ref, x_ref, o_ref):
    # m_ref: (H*W, HoWo_pad)  blur + stride-2 operator, reflect pad folded in,
    #                         columns zero-padded to a multiple of 128
    # x_ref: (TP, H*W)        TP flattened (b, c) planes
    # o_ref: (TP, HoWo_pad)
    x = x_ref[...].astype(m_ref.dtype)  # no-op when dtypes already match
    acc = jnp.dot(x, m_ref[...], preferred_element_type=jnp.float32)
    o_ref[...] = acc.astype(o_ref.dtype)


def _downsample_separable_kernel(awt_ref, ah_ref, x_ref, o_ref):
    # awt_ref: (W, Wo)   A_w^T  blur + stride operator along W (pad folded in)
    # ah_ref:  (Ho, H)   A_h    blur + stride operator along H (pad folded in)
    # x_ref:   (TP, H, W)
    # o_ref:   (TP, Ho, Wo)
    awt = awt_ref[...]
    ah = ah_ref[...]
    n_planes = x_ref.shape[0]

    def body(p, carry):
        xp = x_ref[p].astype(awt.dtype)                                   # (H, W)
        t = jnp.dot(xp, awt, preferred_element_type=jnp.float32)          # (H, Wo)
        z = jnp.dot(ah, t.astype(ah.dtype),
                    preferred_element_type=jnp.float32)                   # (Ho, Wo)
        o_ref[p] = z.astype(o_ref.dtype)
        return carry

    lax.fori_loop(0, n_planes, body, 0, unroll=4)


# ---------------------------------------------------------------------------
# Host-side helpers
# ---------------------------------------------------------------------------
def _blur_stride_operator(n_in, n_out):
    """A s.t. (A @ v) == stride-2 [1,2,1]/4 blur of reflect-pad(1) applied to v."""
    w = np.array([0.25, 0.5, 0.25], np.float64)
    a = np.zeros((n_out, n_in), np.float64)
    for i in range(n_out):
        for d in range(3):
            src = 2 * i + d - 1            # source index in the *unpadded* signal
            if src < 0:
                src = -src                 # reflect: -1 -> 1
            elif src >= n_in:
                src = 2 * n_in - 2 - src   # reflect:  n -> n-2
            a[i, src] += w[d]
    return a


def _tpu_vmem_and_cores():
    """(per-core VMEM capacity bytes, TensorCores sharing the grid), safe fallbacks."""
    vmem_cap = None
    try:
        cap = getattr(pltpu.get_tpu_info(), "vmem_capacity_bytes", None)
        if cap:
            vmem_cap = int(cap)
    except Exception:
        pass
    kind = ""
    try:
        kind = jax.devices()[0].device_kind.lower()
    except Exception:
        pass
    dual_core = any(tag in kind for tag in ("v7", "7x", "v4", "v5p"))
    if vmem_cap is None:
        vmem_cap = 64 * 1024 * 1024   # conservative: v7x per-core VMEM
        dual_core = True              # and be conservative about core balance
    if dual_core:
        vmem_cap = min(vmem_cap, 64 * 1024 * 1024)
    return vmem_cap, (2 if dual_core else 1)


def _vmem_limit_bytes(vmem_cap):
    # ~70% of per-core VMEM: ~45 MiB on v7x (64 MiB/core), ~90 MiB on v5e/v6e (128 MiB).
    return max(32 * 1024 * 1024, min(int(vmem_cap * 0.70), 100 * 1024 * 1024))


def _choose_tile_planes(n_planes, per_plane_bytes, fixed_bytes, vmem_limit,
                        n_cores, max_tp):
    """Planes per grid step: fill VMEM; keep the step count TensorCore-balanced."""
    unit = 8
    budget = int(vmem_limit * 0.75) - fixed_bytes
    budget = max(budget, 2 * 1024 * 1024)
    cap = budget // max(per_plane_bytes, 1)
    cap = max(unit, (cap // unit) * unit)
    cap = min(cap, max_tp)
    tp = min(n_planes, cap)
    tp = min(_round_up(tp, unit), cap)
    if n_cores > 1 and n_planes >= 2 * unit:
        # Prefer an even number of grid steps (>= 2) so both TensorCores get
        # equal work; re-verify parity after rounding tp to the sublane unit.
        steps = pl.cdiv(n_planes, tp)
        if steps % 2 == 1:
            for cand_steps in (steps + 1, steps + 3, steps + 5):
                cand_tp = min(_round_up(pl.cdiv(n_planes, cand_steps), unit), cap)
                if pl.cdiv(n_planes, cand_tp) % 2 == 0:
                    tp = cand_tp
                    break
    return tp


# ---------------------------------------------------------------------------
# Public entry point
# ---------------------------------------------------------------------------
def downsample(x, channels, filt_size=3, stride=2):
    """Pallas equivalent of timm Downsample.forward (filt_size=3, stride=2)."""
    assert filt_size == 3 and stride == 2
    B, C, H, W = x.shape
    assert C == channels
    assert H >= 2 and W >= 2, "reflect padding needs spatial dims >= 2"

    P = B * C
    Ho = (H - 1) // 2 + 1            # (H + 2*pad - filt) // stride + 1
    Wo = (W - 1) // 2 + 1
    HW, HoWo = H * W, Ho * Wo

    in_item = np.dtype(x.dtype).itemsize
    # bf16 inputs feed the MXU as bf16 (f32 accumulation); everything else f32.
    op_dtype = jnp.bfloat16 if x.dtype == jnp.bfloat16 else jnp.float32
    op_item = np.dtype(op_dtype).itemsize

    # Separable [1,2,1]/4 blur + stride-2 operators, reflect padding folded in.
    a_h = _blur_stride_operator(H, Ho)               # (Ho, H)
    a_w = _blur_stride_operator(W, Wo)               # (Wo, W)

    vmem_cap, n_cores = _tpu_vmem_and_cores()
    vmem_limit = _vmem_limit_bytes(vmem_cap)

    # Dense Kronecker path only for small planes (<= ~32x32): beyond that the
    # operator grows as H^2*W^2/4 and FLOPs as HW per output, so the separable
    # two-matmul path takes over.
    use_dense = HW <= 1024

    if use_dense:
        # Lane-dense output: pad operator columns (and the output) to a
        # multiple of 128 so stores are full vst, not masked vst.msk.
        HoWo_pad = _round_up(HoWo, 128)
        m_np = np.zeros((HW, HoWo_pad), np.float64)
        # M[h*W + w, i*Wo + j] = a_h[i, h] * a_w[j, w]
        m_np[:, :HoWo] = np.kron(a_h, a_w).T
        m = jnp.asarray(m_np, dtype=op_dtype)

        x2d = x.reshape(P, HW)                       # free row-major reshape

        hw_lanes = _round_up(HW, 128)
        per_plane = (2 * hw_lanes * in_item          # double-buffered input rows
                     + hw_lanes * op_item            # astype copy feeding the MXU
                     + HoWo_pad * 4                  # f32 accumulator row
                     + 3 * HoWo_pad * in_item)       # cast + double-buffered out rows
        op_vmem = _round_up(HW, 8) * HoWo_pad * op_item
        tp = _choose_tile_planes(P, per_plane, 2 * op_vmem, vmem_limit, n_cores,
                                 max_tp=4096)
        grid = (pl.cdiv(P, tp),)

        cost = pl.CostEstimate(
            flops=2 * P * HW * HoWo_pad,
            transcendentals=0,
            bytes_accessed=P * (HW + HoWo_pad) * in_item + HW * HoWo_pad * op_item,
        )

        out2d = pl.pallas_call(
            _downsample_dense_kernel,
            out_shape=jax.ShapeDtypeStruct((P, HoWo_pad), x.dtype),
            grid_spec=pltpu.PrefetchScalarGridSpec(
                num_scalar_prefetch=0,
                grid=grid,
                in_specs=[
                    pl.BlockSpec((HW, HoWo_pad), lambda i: (0, 0)),    # operator (resident)
                    pl.BlockSpec((tp, HW), lambda i: (i, 0)),          # lane-dense input
                ],
                out_specs=pl.BlockSpec((tp, HoWo_pad), lambda i: (i, 0)),
            ),
            compiler_params=pltpu.CompilerParams(
                dimension_semantics=("parallel",),
                vmem_limit_bytes=vmem_limit,
            ),
            cost_estimate=cost,
        )(m, x2d)

        if HoWo_pad != HoWo:
            out2d = out2d[:, :HoWo]
        return out2d.reshape(B, C, Ho, Wo)

    # ---- separable path: t = x_p @ A_w^T, out_p = A_h @ t, per plane --------
    awt = jnp.asarray(a_w.T, dtype=op_dtype)         # (W, Wo)
    ah = jnp.asarray(a_h, dtype=op_dtype)            # (Ho, H)
    x3 = x.reshape(P, H, W)                          # free row-major reshape

    h8, ho8, w8 = _round_up(H, 8), _round_up(Ho, 8), _round_up(W, 8)
    w_lanes, wo_lanes = _round_up(W, 128), _round_up(Wo, 128)
    h_lanes = _round_up(H, 128)
    per_plane = (2 * h8 * w_lanes * in_item          # double-buffered input block
                 + 3 * ho8 * wo_lanes * in_item)     # cast + double-buffered output
    fixed = (2 * (w8 * wo_lanes + ho8 * h_lanes) * op_item   # resident operators
             + 4 * h8 * max(w_lanes, wo_lanes) * 4)          # per-plane loop temps
    tp = _choose_tile_planes(P, per_plane, fixed, vmem_limit, n_cores, max_tp=512)
    grid = (pl.cdiv(P, tp),)

    cost = pl.CostEstimate(
        flops=2 * P * H * Wo * (W + Ho),
        transcendentals=0,
        bytes_accessed=P * (HW + HoWo) * in_item + (W * Wo + Ho * H) * op_item,
    )

    out3 = pl.pallas_call(
        _downsample_separable_kernel,
        out_shape=jax.ShapeDtypeStruct((P, Ho, Wo), x.dtype),
        grid_spec=pltpu.PrefetchScalarGridSpec(
            num_scalar_prefetch=0,
            grid=grid,
            in_specs=[
                pl.BlockSpec((W, Wo), lambda i: (0, 0)),        # A_w^T (resident)
                pl.BlockSpec((Ho, H), lambda i: (0, 0)),        # A_h   (resident)
                pl.BlockSpec((tp, H, W), lambda i: (i, 0, 0)),  # plane tile
            ],
            out_specs=pl.BlockSpec((tp, Ho, Wo), lambda i: (i, 0, 0)),
        ),
        compiler_params=pltpu.CompilerParams(
            dimension_semantics=("parallel",),
            vmem_limit_bytes=vmem_limit,
        ),
        cost_estimate=cost,
    )(awt, ah, x3)

    return out3.reshape(B, C, Ho, Wo)


# ---------------------------------------------------------------------------
# Pure-JAX reference and self-test
# ---------------------------------------------------------------------------
def _reference(x, channels):
    """Reflect pad + grouped 3x3 stride-2 conv, exactly as the PyTorch module."""
    filt_1d = np.array([1.0, 2.0, 1.0], np.float32)
    filt_2d = np.outer(filt_1d, filt_1d)
    filt_2d = filt_2d / filt_2d.sum()
    w = jnp.asarray(np.broadcast_to(filt_2d, (channels, 1, 3, 3)))  # (O=C, I/g=1, 3, 3)
    x_pad = jnp.pad(x, ((0, 0), (0, 0), (1, 1), (1, 1)), mode="reflect")
    return lax.conv_general_dilated(
        x_pad, w,
        window_strides=(2, 2),
        padding="VALID",
        dimension_numbers=("NCHW", "OIHW", "NCHW"),
        feature_group_count=channels,
    )


if __name__ == "__main__":
    # Small planes -> dense Kronecker path (like GhostNet's deep stages).
    B, C, H, W = 2, 4, 16, 16
    x = jax.random.normal(jax.random.PRNGKey(0), (B, C, H, W), dtype=jnp.float32)
    out = jax.block_until_ready(downsample(x, channels=C, filt_size=3, stride=2))
    ref = jax.block_until_ready(_reference(x, C))
    assert out.shape == (B, C, 8, 8), out.shape
    np.testing.assert_allclose(np.asarray(out), np.asarray(ref), rtol=1e-5, atol=1e-5)

    # Larger planes -> separable two-matmul path.
    B2, C2, H2, W2 = 1, 8, 40, 40
    x2 = jax.random.normal(jax.random.PRNGKey(0), (B2, C2, H2, W2), dtype=jnp.float32)
    out2 = jax.block_until_ready(downsample(x2, channels=C2, filt_size=3, stride=2))
    ref2 = jax.block_until_ready(_reference(x2, C2))
    assert out2.shape == (B2, C2, 20, 20), out2.shape
    np.testing.assert_allclose(np.asarray(out2), np.asarray(ref2), rtol=1e-5, atol=1e-5)

    print("KERNEL_OK")
</pallas_src>

<mosaic_0001>
module attributes {stable_mosaic.version = 11 : i64} {
  func.func @_downsample_dense_kernel(%arg0: i32, %arg1: memref<256x128xf32, #tpu.memory_space<vmem>>, %arg2: memref<8x256xf32, #tpu.memory_space<vmem>>, %arg3: memref<8x128xf32, #tpu.memory_space<vmem>>) attributes {dimension_semantics = [#tpu.dimension_semantics<parallel>], iteration_bounds = array<i64: 1>, scalar_prefetch = 0 : i64, scratch_operands = 0 : i64, tpu.core_type = #tpu.core_type<tc>, window_params = [{pipeline_mode = #tpu.pipeline_mode<synchronous>, transform_indices = @transform_0, window_bounds = array<i64: 256, 128>}, {transform_indices = @transform_1, window_bounds = array<i64: 8, 256>}, {transform_indices = @transform_2, window_bounds = array<i64: 8, 128>}]} {
    %c0 = arith.constant 0 : index
    %c0_0 = arith.constant 0 : index
    %0 = vector.load %arg2[%c0, %c0_0] : memref<8x256xf32, #tpu.memory_space<vmem>>, vector<8x256xf32>
    %c0_1 = arith.constant 0 : index
    %c0_2 = arith.constant 0 : index
    %1 = vector.load %arg1[%c0_1, %c0_2] : memref<256x128xf32, #tpu.memory_space<vmem>>, vector<256x128xf32>
    %cst = arith.constant dense<0.000000e+00> : vector<8x128xf32>
    %2 = tpu.matmul %0, %1, %cst {dimension_numbers = #tpu.dot_dimension_numbers<[1], [0], [0], [1], [0, 0, 1, 1], [], []>} : vector<8x256xf32>, vector<256x128xf32>, vector<8x128xf32> -> vector<8x128xf32>
    %c0_3 = arith.constant 0 : index
    %c0_4 = arith.constant 0 : index
    %3 = vector.load %arg3[%c0_3, %c0_4] : memref<8x128xf32, #tpu.memory_space<vmem>>, vector<8x128xf32>
    tpu.vector_store %arg3[%c0_3, %c0_4], %2 {strides = array<i32>} : memref<8x128xf32, #tpu.memory_space<vmem>>, vector<8x128xf32>,
    return
  }
  func.func @transform_0(%arg0: i32) -> (i32, i32) {
    %c0_i32 = arith.constant 0 : i32
    %c0_i32_0 = arith.constant 0 : i32
    %c0_i32_1 = arith.constant 0 : i32
    return %c0_i32, %c0_i32_0 : i32, i32
  }
  func.func @transform_1(%arg0: i32) -> (i32, i32) {
    %c0_i32 = arith.constant 0 : i32
    %c0_i32_0 = arith.constant 0 : i32
    return %arg0, %c0_i32 : i32, i32
  }
  func.func @transform_2(%arg0: i32) -> (i32, i32) {
    %c0_i32 = arith.constant 0 : i32
    %c0_i32_0 = arith.constant 0 : i32
    return %arg0, %c0_i32 : i32, i32
  }
}

</mosaic_0001>

<bundles_post_ra>
// kernel: tpu_custom_call.1
= control target key start
LH: loop header
LB: loop body
LE: loop exit
PB: predicated region body
PF: predicated region fallthrough
CT: control target
= control target key end

     0   :  { %7 = vsyncpa [#allocation3], 0  ;;  %s359_s0 = inlined_call_operand.hbm [shape: f32[256,128], index: 0, kind: input, shape index: {}]   ;;  %s360_s1 = inlined_call_operand.hbm [shape: f32[8,256], index: 1, kind: input, shape index: {}]   ;;  %s361_s2 = inlined_call_operand.hbm [shape: f32[8,128], index: 2, kind: output, shape index: {}]  }
   0x1   :  { %8 = vsyncpa [#allocation6], 0 }
   0x2   :  { %9 = vsyncpa [#allocation4], 0  ;;  %s303_s9 = smov [#allocation2]   ;;  %s231_s13 = scalar_lea.hbm %s359_s0, 4096 }
   0x3   :  { %s15_s10 = sshll.u32 %s303_s9, 4  ;;  %p232_p0 = scmp.ne.s32.totalorder %s359_s0, %s231_s13  ;;  %s16_s10 = int_to_ptr.vmem [resolvable:$true] %s15_s10 }
   0x4   :  { %p235_p1 = scmp.lt.u32.totalorder %s231_s13, %s359_s0 }
   0x6   :  { %p237_p2 = pnand %p235_p1, %p232_p0 }
   0x8   :  { %240 = shalt.err (!%p237_p2)
}
   0x9   :  { %s241_s18 = scalar_lea.vmem %s16_s10, 4096  ;;  %p246_p4 = scmp.lt.s32.totalorder %s16_s10, %s16_s10 }
   0xa   :  { %p242_p3 = scmp.ne.s32.totalorder %s16_s10, %s241_s18  ;;  %p247_p5 = scmp.lt.s32.totalorder %s241_s18, %s241_s18 }
   0xc   :  { %p248_p6 = por %p247_p5, %p246_p4 }
   0xe   :  { %p249_p7 = pnand %p248_p6, %p242_p3 }
  0x10   :  { %252 = shalt.err (!%p249_p7)
}
  0x11   :  { %s304_s19 = smov 128   ;;  %s305_s20 = smov 8  }
  0x12   :  { %21 = dma.hbm_to_vmem [thread:$0]  %s359_s0, 4096, %s16_s10, [#allocation3], %s304_s19, %s304_s19, %s305_s20  }
  0x13   :  { %s306_s23 = smov [#allocation5]   ;;  %s253_s27 = scalar_lea.hbm %s360_s1, 256 }
  0x14   :  { %s28_s24 = sshll.u32 %s306_s23, 4  ;;  %p254_p8 = scmp.ne.s32.totalorder %s360_s1, %s253_s27  ;;  %s29_s24 = int_to_ptr.vmem [resolvable:$true] %s28_s24 }
  0x15   :  { %p257_p9 = scmp.lt.u32.totalorder %s253_s27, %s360_s1 }
  0x17   :  { %p259_p10 = pnand %p257_p9, %p254_p8 }
  0x19   :  { %262 = shalt.err (!%p259_p10)
}
  0x1a   :  { %s263_s4 = scalar_lea.vmem %s29_s24, 256  ;;  %p268_p12 = scmp.lt.s32.totalorder %s29_s24, %s29_s24 }
  0x1b   :  { %p264_p11 = scmp.ne.s32.totalorder %s29_s24, %s263_s4  ;;  %p269_p13 = scmp.lt.s32.totalorder %s263_s4, %s263_s4 }
  0x1d   :  { %p270_p0 = por %p269_p13, %p268_p12 }
  0x1f   :  { %p271_p1 = pnand %p270_p0, %p264_p11 }
  0x21   :  { %274 = shalt.err (!%p271_p1)
}
  0x22   :  { %31 = dma.hbm_to_vmem [thread:$0]  %s360_s1, 256, %s29_s24, [#allocation6]  }
  0x23   :  { %297 = dma.done.wait [#allocation3], 4096  }
  0x24   :  { %298 = vsyncadd [#allocation3], 4294963200 }
  0x25   :  { %299 = dma.done.wait [#allocation6], 256  }
  0x26   :  { %300 = vsyncadd [#allocation6], 4294967040  ;;  %v56_v0 = vld [vmem:[#allocation2 + $0x80] sm:$0xff]  ;;  %v57_v1 = vld [vmem:[#allocation2 + $0x88] sm:$0xff]  ;;  %s307_s1 = smov [#allocation7]  }
  0x27   :  { %v40_v2 = vld [vmem:[#allocation2] sm:$0xff]  ;;  %v194_v3 = vpack.c.bf16 %v57_v1, %v56_v0  ;;  %v41_v4 = vld [vmem:[#allocation2 + $0x8] sm:$0xff]  ;;  %v58_v5 = vld [vmem:[#allocation2 + $0x90] sm:$0xff]  ;;  %s149_s6 = sshll.u32 %s307_s1, 4  ;;  %s150_s6 = int_to_ptr.vmem [resolvable:$true] %s149_s6 }
  0x28   :  { %v59_v6 = vld [vmem:[#allocation2 + $0x98] sm:$0xff]  ;;  %v196_v7 = vpack.c.bf16 %v41_v4, %v40_v2  ;;  %v42_v9 = vld [vmem:[#allocation2 + $0x10] sm:$0xff]  ;;  %v60_v11 = vld [vmem:[#allocation2 + $0xa0] sm:$0xff]  ;;  %s275_s7 = scalar_lea.vmem %s150_s6, 128  ;;  %p280_p3 = scmp.lt.s32.totalorder %s150_s6, %s150_s6 }
  0x29   :  { %v198_v8 = vpack.c.bf16 %v59_v6, %v58_v5  ;;  %v43_v10 = vld [vmem:[#allocation2 + $0x18] sm:$0xff]  ;;  %195 = vmatprep.subr.bf16.mxu0 %v194_v3  ;;  %v61_v12 = vld [vmem:[#allocation2 + $0xa8] sm:$0xff]  ;;  %v44_v15 = vld [vmem:[#allocation2 + $0x20] sm:$0xff]  ;;  %p276_p2 = scmp.ne.s32.totalorder %s150_s6, %s275_s7  ;;  %p281_p4 = scmp.lt.s32.totalorder %s275_s7, %s275_s7 }
  0x2a   :  { %197 = vmatpush3.bf16.msra.mxu0 %v196_v7  ;;  %v200_v13 = vpack.c.bf16 %v43_v10, %v42_v9  ;;  %v202_v14 = vpack.c.bf16 %v61_v12, %v60_v11  ;;  %v45_v16 = vld [vmem:[#allocation2 + $0x28] sm:$0xff]  ;;  %v62_v17 = vld [vmem:[#allocation2 + $0xb0] sm:$0xff]  ;;  %v63_v18 = vld [vmem:[#allocation2 + $0xb8] sm:$0xff] }
  0x2b   :  { %199 = vmatprep.subr.bf16.mxu0 %v198_v8  ;;  %v204_v19 = vpack.c.bf16 %v45_v16, %v44_v15  ;;  %v206_v20 = vpack.c.bf16 %v63_v18, %v62_v17  ;;  %v46_v21 = vld [vmem:[#allocation2 + $0x30] sm:$0xff]  ;;  %v47_v22 = vld [vmem:[#allocation2 + $0x38] sm:$0xff]  ;;  %v64_v23 = vld [vmem:[#allocation2 + $0xc0] sm:$0xff]  ;;  %p282_p5 = por %p281_p4, %p280_p3 }
  0x2c   :  { %v65_v24 = vld [vmem:[#allocation2 + $0xc8] sm:$0xff]  ;;  %v208_v26 = vpack.c.bf16 %v47_v22, %v46_v21  ;;  %v48_v28 = vld [vmem:[#allocation2 + $0x40] sm:$0xff]  ;;  %v66_v30 = vld [vmem:[#allocation2 + $0xd0] sm:$0xff] }
  0x2d   :  { %v39_v25 = vld [vmem:[#allocation5 + $0x8] sm:$0xff]  ;;  %v210_v27 = vpack.c.bf16 %v65_v24, %v64_v23  ;;  %v67_v31 = vld [vmem:[#allocation2 + $0xd8] sm:$0xff]  ;;  %v50_v34 = vld [vmem:[#allocation2 + $0x50] sm:$0xff]  ;;  %p283_p6 = pnand %p282_p5, %p276_p2 }
  0x2e   :  { %201 = vmatpush3.bf16.msra.mxu0 %v200_v13  ;;  %136 = vmatprep.mubr.f32.mxu0 %v39_v25  ;;  %v49_v29 = vld [vmem:[#allocation2 + $0x48] sm:$0xff]  ;;  %v214_v33 = vpack.c.bf16 %v67_v31, %v66_v30  ;;  %v51_v35 = vld [vmem:[#allocation2 + $0x58] sm:$0xff]  ;;  %v68_v36 = vld [vmem:[#allocation2 + $0xe0] sm:$0xff] }
  0x2f   :  { %203 = vmatprep.subr.bf16.mxu0 %v202_v14  ;;  %v212_v32 = vpack.c.bf16 %v49_v29, %v48_v28  ;;  %v69_v37 = vld [vmem:[#allocation2 + $0xe8] sm:$0xff]  ;;  %v216_v38 = vpack.c.bf16 %v51_v35, %v50_v34  ;;  %v52_v40 = vld [vmem:[#allocation2 + $0x60] sm:$0xff]  ;;  %v70_v42 = vld [vmem:[#allocation2 + $0xf0] sm:$0xff] }
  0x30   :  { %v218_v39 = vpack.c.bf16 %v69_v37, %v68_v36  ;;  %v53_v41 = vld [vmem:[#allocation2 + $0x68] sm:$0xff]  ;;  %v71_v43 = vld [vmem:[#allocation2 + $0xf8] sm:$0xff]  ;;  %v54_v46 = vld [vmem:[#allocation2 + $0x70] sm:$0xff] }
  0x31   :  { %v220_v44 = vpack.c.bf16 %v53_v41, %v52_v40  ;;  %v222_v45 = vpack.c.bf16 %v71_v43, %v70_v42  ;;  %v55_v47 = vld [vmem:[#allocation2 + $0x78] sm:$0xff]  ;;  %v38_v49 = vld [vmem:[#allocation5] sm:$0xff] }
  0x32   :  { %205 = vmatpush3.bf16.msra.mxu0 %v204_v19  ;;  %v224_v48 = vpack.c.bf16 %v55_v47, %v54_v46 }
  0x33   :  { %207 = vmatprep.subr.bf16.mxu0 %v206_v20 }
  0x36   :  { %209 = vmatpush3.bf16.msra.mxu0 %v208_v26 }
  0x37   :  { %211 = vmatprep.subr.bf16.mxu0 %v210_v27 }
  0x3a   :  { %213 = vmatpush3.bf16.msra.mxu0 %v212_v32 }
  0x3b   :  { %215 = vmatprep.subr.bf16.mxu0 %v214_v33 }
  0x3e   :  { %217 = vmatpush3.bf16.msra.mxu0 %v216_v38 }
  0x3f   :  { %219 = vmatprep.subr.bf16.mxu0 %v218_v39 }
  0x42   :  { %221 = vmatpush3.bf16.msra.mxu0 %v220_v44 }
  0x43   :  { %223 = vmatprep.subr.bf16.mxu0 %v222_v45 }
  0x46   :  { %225 = vmatpush3.bf16.msra.mxu0 %v224_v48 }
  0x49   :  { %137 = vmatmul.mubr.f32.vlgmr.msra.gmra.mrb[0].mxu0 %v38_v49 }
 0x11c   :  { %v191_v50 = vpop.f32.mrb[0].mxu0 }
 0x11d   :  { %v192_v51 = vpop.f32.mrb[1].mxu0 }
 0x11e   :  { %v193_v52 = vadd.f32 %v192_v51, %v191_v50 }
 0x120   :  { %142 = vst [vmem:[#allocation7] sm:$0xff] %v193_v52 }
 0x121   :  { %286 = shalt.err (!%p283_p6)
}
 0x122   :  { %s287_s10 = scalar_lea.hbm %s361_s2, 128 }
 0x123   :  { %p288_p7 = scmp.ne.s32.totalorder %s361_s2, %s287_s10  ;;  %p291_p8 = scmp.lt.u32.totalorder %s287_s10, %s361_s2 }
 0x125   :  { %p293_p9 = pnand %p291_p8, %p288_p7 }
 0x127   :  { %296 = shalt.err (!%p293_p9)
}
 0x128   :  { %152 = dma.vmem_to_hbm [thread:$0]  %s150_s6, 128, %s361_s2, [#allocation4]  }
 0x129   :  { %301 = dma.done.wait [#allocation4], 128  }
 0x12a   :  { %302 = vsyncadd [#allocation4], 4294967168 }
 0x12b   :  { %156 = vsyncpa [#allocation3], 1 }
 0x12c   :  { %157 = vsyncpa [#allocation6], 1 }
 0x12d   :  { %158 = vsyncpa [#allocation4], 1 }

</bundles_post_ra>
